<compile_context>
chip_gen: v6e
topology: v6e:2x2x1
jax: 0.10.0
libtpu: 0.0.40
codegen_flags: <defaults>
</compile_context>

<pallas_src>
import functools

import jax
import jax.numpy as jnp
from jax.experimental import pallas as pl
from jax.experimental.pallas import tpu as pltpu


def _action_loss_kernel(chan_ref, o_ref, t_ref, out_ref, *, inv_bce, inv_mse, inv_ce):
    chan = chan_ref[...]                         # (1, 12T) int32: lane -> channel index
    o = o_ref[...].astype(jnp.float32)           # (tb, 12T)
    t = t_ref[...].astype(jnp.float32)

    is_bce = chan < 8                            # keyboard channels
    is_m8 = chan == 8                            # mouse-action logits
    is_m9 = chan == 9                            # mouse-event logits
    is_ce = is_m8 | is_m9
    is_mse = chan >= 10                          # mouse position

    # ---- BCE (select input first so non-BCE lanes never reach the logs) ----
    o_b = jnp.where(is_bce, o, 0.5)
    log_o = jnp.maximum(jnp.log(o_b), -100.0)          # PyTorch BCELoss clamps at -100
    log_1mo = jnp.maximum(jnp.log(1.0 - o_b), -100.0)
    bce_elem = -(t * log_o + (1.0 - t) * log_1mo)
    bce_sum = jnp.sum(jnp.where(is_bce, bce_elem, 0.0))

    # ---- MSE ----
    diff = o - t
    mse_sum = jnp.sum(jnp.where(is_mse, diff * diff, 0.0))

    # ---- soft-label CE over the T (class) axis, both channels via masked row reductions.
    # CE_row = lse * sum(p) - sum(p * logit); one shared exp pass for both channels.
    neg_inf = jnp.float32(-jnp.inf)
    m8 = jnp.max(jnp.where(is_m8, o, neg_inf), axis=-1, keepdims=True)   # (tb, 1)
    m9 = jnp.max(jnp.where(is_m9, o, neg_inf), axis=-1, keepdims=True)
    z = jnp.where(is_m8, o - m8, jnp.where(is_m9, o - m9, neg_inf))
    e = jnp.exp(z)                                                        # exp(-inf) == 0
    se8 = jnp.sum(jnp.where(is_m8, e, 0.0), axis=-1, keepdims=True)
    se9 = jnp.sum(jnp.where(is_m9, e, 0.0), axis=-1, keepdims=True)
    lse8 = m8 + jnp.log(se8)
    lse9 = m9 + jnp.log(se9)
    s8 = jnp.sum(jnp.where(is_m8, t, 0.0), axis=-1, keepdims=True)
    s9 = jnp.sum(jnp.where(is_m9, t, 0.0), axis=-1, keepdims=True)
    cross = jnp.sum(jnp.where(is_ce, t * o, 0.0))
    ce_sum = jnp.sum(lse8 * s8 + lse9 * s9) - cross

    partial = bce_sum * inv_bce + mse_sum * inv_mse + ce_sum * inv_ce
    out_ref[...] = jnp.full(out_ref.shape, partial, dtype=out_ref.dtype)


@functools.lru_cache(maxsize=None)
def _vmem_plan():
    """(vmem_limit_bytes, tile_budget_bytes), generation-gated."""
    phys = 0
    try:
        phys = int(pltpu.get_tpu_info().vmem_capacity_bytes)
    except Exception:
        phys = 0
    if phys >= 128 * 1024 * 1024:                  # v5e / v6e: 128 MiB physical VMEM
        return 64 * 1024 * 1024, 48 * 1024 * 1024
    # v7x (64 MiB per TensorCore) or unknown -> conservative but still large tiles.
    return 48 * 1024 * 1024, 32 * 1024 * 1024


def _choose_batch_tile(batch, t, tile_budget_bytes, sublane):
    """Pick (batch_tile, padded_batch). Budget counts both f32 tensors, double-buffered."""
    row_bytes = 2 * 2 * 12 * t * 4                 # 2 tensors x 2 buffers x 12T x 4B
    cap = max(1, tile_budget_bytes // row_bytes)
    if batch <= cap:
        return batch, batch                        # full-extent block, no padding
    tb = max(sublane, (min(cap, batch) // sublane) * sublane)
    if batch % tb == 0:
        return tb, batch
    # Prefer a divisor of batch (avoids a padding copy) as long as tiles stay large.
    cand = tb
    floor = max(sublane, tb // 4)
    while cand >= floor:
        if batch % cand == 0:
            return cand, batch
        cand -= sublane
    return tb, pl.cdiv(batch, tb) * tb             # zero-pad the batch axis


@jax.jit
def action_loss(outputs, targets):
    B, T, D = outputs.shape
    assert D == 12, "ActionLoss expects 12 channels (8 kb + 1 ma + 1 me + 2 pos)"

    vmem_limit, tile_budget = _vmem_plan()
    sublane = 8 if outputs.dtype.itemsize >= 4 else 16   # (8,128)/(16,128) sublane rule
    tb, Bp = _choose_batch_tile(B, T, tile_budget, sublane)
    assert Bp % tb == 0

    # Free, contiguous reshape: lane index = t*12 + channel. No relayout copies.
    o2 = outputs.reshape(B, 12 * T)
    t2 = targets.reshape(B, 12 * T)
    if Bp != B:
        pad = ((0, Bp - B), (0, 0))                # zero rows contribute 0 to every term
        o2 = jnp.pad(o2, pad)
        t2 = jnp.pad(t2, pad)
    nb = Bp // tb

    chan = (jnp.arange(12 * T, dtype=jnp.int32) % 12).reshape(1, 12 * T)

    kernel = functools.partial(
        _action_loss_kernel,
        inv_bce=1.0 / (B * T * 8),
        inv_mse=1.0 / (B * T * 2),
        inv_ce=1.0 / B,
    )

    partials = pl.pallas_call(
        kernel,
        out_shape=jax.ShapeDtypeStruct((1, nb * 128), jnp.float32),
        grid=(nb,),
        in_specs=[
            pl.BlockSpec((1, 12 * T), lambda i: (0, 0)),     # constant channel row
            pl.BlockSpec((tb, 12 * T), lambda i: (i, 0)),    # outputs
            pl.BlockSpec((tb, 12 * T), lambda i: (i, 0)),    # targets
        ],
        out_specs=pl.BlockSpec((1, 128), lambda i: (0, i)),  # lane-dense per-block partials
        compiler_params=pltpu.CompilerParams(
            dimension_semantics=("parallel",),               # no carried state -> v7x 2-TC split
            vmem_limit_bytes=vmem_limit,
        ),
    )(chan, o2, t2)

    # Each (1,128) block holds its partial replicated across lanes; sum one lane per block.
    return jnp.sum(partials.reshape(nb, 128)[:, 0])


def action_loss_ref(outputs, targets):
    """Pure-JAX reference reproducing the PyTorch module semantics."""
    o = outputs.astype(jnp.float32)
    t = targets.astype(jnp.float32)
    x, y = o[:, :, :8], t[:, :, :8]
    bce = -jnp.mean(
        y * jnp.maximum(jnp.log(x), -100.0)
        + (1.0 - y) * jnp.maximum(jnp.log(1.0 - x), -100.0)
    )

    def soft_ce(logits, probs):
        log_sm = jax.nn.log_softmax(logits, axis=1)
        return jnp.mean(-jnp.sum(probs * log_sm, axis=1))

    ce1 = soft_ce(o[:, :, 8], t[:, :, 8])
    ce2 = soft_ce(o[:, :, 9], t[:, :, 9])
    mse = jnp.mean((o[:, :, 10:] - t[:, :, 10:]) ** 2)
    return bce + ce1 + ce2 + mse


if __name__ == "__main__":
    B, T, D = 2, 8, 12  # 8 keyboard + 1 mouse-action + 1 mouse-event + 2 position

    key = jax.random.PRNGKey(0)
    k_out, k_tgt_kb, k_tgt_ma, k_tgt_me, k_tgt_pos = jax.random.split(key, 5)

    # Model outputs: BCE channels must be valid probabilities -> sigmoid them.
    raw = jax.random.normal(k_out, (B, T, D), dtype=jnp.float32)
    outputs = jnp.concatenate(
        [jax.nn.sigmoid(raw[:, :, :8]), raw[:, :, 8:]], axis=-1
    )

    # Targets: keyboard in [0,1]; mouse action/event as soft class distributions over the
    # T axis (matching soft-label CE semantics); positions arbitrary.
    tgt_kb = jax.random.uniform(k_tgt_kb, (B, T, 8), dtype=jnp.float32)
    tgt_ma = jax.nn.softmax(
        jax.random.normal(k_tgt_ma, (B, T, 1), dtype=jnp.float32), axis=1
    )
    tgt_me = jax.nn.softmax(
        jax.random.normal(k_tgt_me, (B, T, 1), dtype=jnp.float32), axis=1
    )
    tgt_pos = jax.random.normal(k_tgt_pos, (B, T, 2), dtype=jnp.float32)
    targets = jnp.concatenate([tgt_kb, tgt_ma, tgt_me, tgt_pos], axis=-1)

    loss = jax.block_until_ready(action_loss(outputs, targets))
    ref = jax.block_until_ready(action_loss_ref(outputs, targets))
    assert jnp.allclose(loss, ref, rtol=1e-5, atol=1e-5), (loss, ref)

    print("KERNEL_OK")
</pallas_src>

<mosaic_0001>
module attributes {stable_mosaic.version = 11 : i64} {
  func.func @_action_loss_kernel(%arg0: i32, %arg1: memref<1x96xi32, #tpu.memory_space<vmem>>, %arg2: memref<2x96xf32, #tpu.memory_space<vmem>>, %arg3: memref<2x96xf32, #tpu.memory_space<vmem>>, %arg4: memref<1x128xf32, #tpu.memory_space<vmem>>) attributes {dimension_semantics = [#tpu.dimension_semantics<parallel>], iteration_bounds = array<i64: 1>, scalar_prefetch = 0 : i64, scratch_operands = 0 : i64, tpu.core_type = #tpu.core_type<tc>, window_params = [{pipeline_mode = #tpu.pipeline_mode<synchronous>, transform_indices = @transform_0, window_bounds = array<i64: 1, 96>}, {transform_indices = @transform_1, window_bounds = array<i64: 2, 96>}, {transform_indices = @transform_2, window_bounds = array<i64: 2, 96>}, {transform_indices = @transform_3, window_bounds = array<i64: 1, 128>}]} {
    %c0 = arith.constant 0 : index
    %c0_0 = arith.constant 0 : index
    %0 = vector.load %arg1[%c0, %c0_0] : memref<1x96xi32, #tpu.memory_space<vmem>>, vector<1x96xi32>
    %c0_1 = arith.constant 0 : index
    %c0_2 = arith.constant 0 : index
    %1 = vector.load %arg2[%c0_1, %c0_2] : memref<2x96xf32, #tpu.memory_space<vmem>>, vector<2x96xf32>
    %c0_3 = arith.constant 0 : index
    %c0_4 = arith.constant 0 : index
    %2 = vector.load %arg3[%c0_3, %c0_4] : memref<2x96xf32, #tpu.memory_space<vmem>>, vector<2x96xf32>
    %c8_i32 = arith.constant 8 : i32
    %3 = vector.broadcast %c8_i32 : i32 to vector<1x96xi32>
    %4 = arith.cmpi slt, %0, %3 : vector<1x96xi32>
    %c8_i32_5 = arith.constant 8 : i32
    %5 = vector.broadcast %c8_i32_5 : i32 to vector<1x96xi32>
    %6 = arith.cmpi eq, %0, %5 : vector<1x96xi32>
    %c9_i32 = arith.constant 9 : i32
    %7 = vector.broadcast %c9_i32 : i32 to vector<1x96xi32>
    %8 = arith.cmpi eq, %0, %7 : vector<1x96xi32>
    %9 = arith.ori %6, %8 : vector<1x96xi1>
    %c10_i32 = arith.constant 10 : i32
    %10 = vector.broadcast %c10_i32 : i32 to vector<1x96xi32>
    %11 = arith.cmpi sge, %0, %10 : vector<1x96xi32>
    %cst = arith.constant 5.000000e-01 : f32
    %12 = vector.shape_cast %4 : vector<1x96xi1> to vector<1x96xi1>
    %13 = vector.broadcast %12 : vector<1x96xi1> to vector<2x96xi1>
    %14 = vector.broadcast %cst : f32 to vector<2x96xf32>
    %15 = arith.select %13, %1, %14 : vector<2x96xi1>, vector<2x96xf32>
    %16 = math.log %15 : vector<2x96xf32>
    %cst_6 = arith.constant -1.000000e+02 : f32
    %17 = vector.broadcast %cst_6 : f32 to vector<2x96xf32>
    %18 = arith.maximumf %16, %17 : vector<2x96xf32>
    %cst_7 = arith.constant 1.000000e+00 : f32
    %19 = vector.broadcast %cst_7 : f32 to vector<2x96xf32>
    %20 = arith.subf %19, %15 : vector<2x96xf32>
    %21 = math.log %20 : vector<2x96xf32>
    %cst_8 = arith.constant -1.000000e+02 : f32
    %22 = vector.broadcast %cst_8 : f32 to vector<2x96xf32>
    %23 = arith.maximumf %21, %22 : vector<2x96xf32>
    %24 = arith.mulf %2, %18 : vector<2x96xf32>
    %cst_9 = arith.constant 1.000000e+00 : f32
    %25 = vector.broadcast %cst_9 : f32 to vector<2x96xf32>
    %26 = arith.subf %25, %2 : vector<2x96xf32>
    %27 = arith.mulf %26, %23 : vector<2x96xf32>
    %28 = arith.addf %24, %27 : vector<2x96xf32>
    %cst_10 = arith.constant 0.000000e+00 : f32
    %29 = vector.broadcast %cst_10 : f32 to vector<2x96xf32>
    %30 = arith.subf %29, %28 : vector<2x96xf32>
    %cst_11 = arith.constant 0.000000e+00 : f32
    %31 = vector.shape_cast %4 : vector<1x96xi1> to vector<1x96xi1>
    %32 = vector.broadcast %31 : vector<1x96xi1> to vector<2x96xi1>
    %33 = vector.broadcast %cst_11 : f32 to vector<2x96xf32>
    %34 = arith.select %32, %30, %33 : vector<2x96xi1>, vector<2x96xf32>
    %35 = vector.shape_cast %34 : vector<2x96xf32> to vector<1x2x96xf32>
    %cst_12 = arith.constant dense<0.000000e+00> : vector<1xf32>
    %36 = vector.multi_reduction <add>, %35, %cst_12 [1, 2] : vector<1x2x96xf32> to vector<1xf32>
    %37 = vector.shape_cast %36 : vector<1xf32> to vector<1x1x1xf32>
    %38 = vector.extract %37[0, 0, 0] : f32 from vector<1x1x1xf32>
    %39 = arith.subf %1, %2 : vector<2x96xf32>
    %40 = arith.mulf %39, %39 : vector<2x96xf32>
    %cst_13 = arith.constant 0.000000e+00 : f32
    %41 = vector.shape_cast %11 : vector<1x96xi1> to vector<1x96xi1>
    %42 = vector.broadcast %41 : vector<1x96xi1> to vector<2x96xi1>
    %43 = vector.broadcast %cst_13 : f32 to vector<2x96xf32>
    %44 = arith.select %42, %40, %43 : vector<2x96xi1>, vector<2x96xf32>
    %45 = vector.shape_cast %44 : vector<2x96xf32> to vector<1x2x96xf32>
    %cst_14 = arith.constant dense<0.000000e+00> : vector<1xf32>
    %46 = vector.multi_reduction <add>, %45, %cst_14 [1, 2] : vector<1x2x96xf32> to vector<1xf32>
    %47 = vector.shape_cast %46 : vector<1xf32> to vector<1x1x1xf32>
    %48 = vector.extract %47[0, 0, 0] : f32 from vector<1x1x1xf32>
    %cst_15 = arith.constant 0xFF800000 : f32
    %49 = vector.shape_cast %6 : vector<1x96xi1> to vector<1x96xi1>
    %50 = vector.broadcast %49 : vector<1x96xi1> to vector<2x96xi1>
    %51 = vector.broadcast %cst_15 : f32 to vector<2x96xf32>
    %52 = arith.select %50, %1, %51 : vector<2x96xi1>, vector<2x96xf32>
    %cst_16 = arith.constant dense<0xFF800000> : vector<2xf32>
    %53 = vector.multi_reduction <maximumf>, %52, %cst_16 [1] : vector<2x96xf32> to vector<2xf32>
    %54 = vector.shape_cast %53 : vector<2xf32> to vector<2x1xf32>
    %cst_17 = arith.constant 0xFF800000 : f32
    %55 = vector.shape_cast %8 : vector<1x96xi1> to vector<1x96xi1>
    %56 = vector.broadcast %55 : vector<1x96xi1> to vector<2x96xi1>
    %57 = vector.broadcast %cst_17 : f32 to vector<2x96xf32>
    %58 = arith.select %56, %1, %57 : vector<2x96xi1>, vector<2x96xf32>
    %cst_18 = arith.constant dense<0xFF800000> : vector<2xf32>
    %59 = vector.multi_reduction <maximumf>, %58, %cst_18 [1] : vector<2x96xf32> to vector<2xf32>
    %60 = vector.shape_cast %59 : vector<2xf32> to vector<2x1xf32>
    %61 = vector.broadcast %54 : vector<2x1xf32> to vector<2x96xf32>
    %62 = arith.subf %1, %61 : vector<2x96xf32>
    %63 = vector.broadcast %60 : vector<2x1xf32> to vector<2x96xf32>
    %64 = arith.subf %1, %63 : vector<2x96xf32>
    %cst_19 = arith.constant 0xFF800000 : f32
    %65 = vector.shape_cast %8 : vector<1x96xi1> to vector<1x96xi1>
    %66 = vector.broadcast %65 : vector<1x96xi1> to vector<2x96xi1>
    %67 = vector.broadcast %cst_19 : f32 to vector<2x96xf32>
    %68 = arith.select %66, %64, %67 : vector<2x96xi1>, vector<2x96xf32>
    %69 = vector.shape_cast %6 : vector<1x96xi1> to vector<1x96xi1>
    %70 = vector.broadcast %69 : vector<1x96xi1> to vector<2x96xi1>
    %71 = arith.select %70, %62, %68 : vector<2x96xi1>, vector<2x96xf32>
    %72 = math.exp %71 : vector<2x96xf32>
    %cst_20 = arith.constant 0.000000e+00 : f32
    %73 = vector.shape_cast %6 : vector<1x96xi1> to vector<1x96xi1>
    %74 = vector.broadcast %73 : vector<1x96xi1> to vector<2x96xi1>
    %75 = vector.broadcast %cst_20 : f32 to vector<2x96xf32>
    %76 = arith.select %74, %72, %75 : vector<2x96xi1>, vector<2x96xf32>
    %cst_21 = arith.constant dense<0.000000e+00> : vector<2xf32>
    %77 = vector.multi_reduction <add>, %76, %cst_21 [1] : vector<2x96xf32> to vector<2xf32>
    %78 = vector.shape_cast %77 : vector<2xf32> to vector<2x1xf32>
    %cst_22 = arith.constant 0.000000e+00 : f32
    %79 = vector.shape_cast %8 : vector<1x96xi1> to vector<1x96xi1>
    %80 = vector.broadcast %79 : vector<1x96xi1> to vector<2x96xi1>
    %81 = vector.broadcast %cst_22 : f32 to vector<2x96xf32>
    %82 = arith.select %80, %72, %81 : vector<2x96xi1>, vector<2x96xf32>
    %cst_23 = arith.constant dense<0.000000e+00> : vector<2xf32>
    %83 = vector.multi_reduction <add>, %82, %cst_23 [1] : vector<2x96xf32> to vector<2xf32>
    %84 = vector.shape_cast %83 : vector<2xf32> to vector<2x1xf32>
    %85 = math.log %78 : vector<2x1xf32>
    %86 = arith.addf %54, %85 : vector<2x1xf32>
    %87 = math.log %84 : vector<2x1xf32>
    %88 = arith.addf %60, %87 : vector<2x1xf32>
    %cst_24 = arith.constant 0.000000e+00 : f32
    %89 = vector.shape_cast %6 : vector<1x96xi1> to vector<1x96xi1>
    %90 = vector.broadcast %89 : vector<1x96xi1> to vector<2x96xi1>
    %91 = vector.broadcast %cst_24 : f32 to vector<2x96xf32>
    %92 = arith.select %90, %2, %91 : vector<2x96xi1>, vector<2x96xf32>
    %cst_25 = arith.constant dense<0.000000e+00> : vector<2xf32>
    %93 = vector.multi_reduction <add>, %92, %cst_25 [1] : vector<2x96xf32> to vector<2xf32>
    %94 = vector.shape_cast %93 : vector<2xf32> to vector<2x1xf32>
    %cst_26 = arith.constant 0.000000e+00 : f32
    %95 = vector.shape_cast %8 : vector<1x96xi1> to vector<1x96xi1>
    %96 = vector.broadcast %95 : vector<1x96xi1> to vector<2x96xi1>
    %97 = vector.broadcast %cst_26 : f32 to vector<2x96xf32>
    %98 = arith.select %96, %2, %97 : vector<2x96xi1>, vector<2x96xf32>
    %cst_27 = arith.constant dense<0.000000e+00> : vector<2xf32>
    %99 = vector.multi_reduction <add>, %98, %cst_27 [1] : vector<2x96xf32> to vector<2xf32>
    %100 = vector.shape_cast %99 : vector<2xf32> to vector<2x1xf32>
    %101 = arith.mulf %2, %1 : vector<2x96xf32>
    %cst_28 = arith.constant 0.000000e+00 : f32
    %102 = vector.shape_cast %9 : vector<1x96xi1> to vector<1x96xi1>
    %103 = vector.broadcast %102 : vector<1x96xi1> to vector<2x96xi1>
    %104 = vector.broadcast %cst_28 : f32 to vector<2x96xf32>
    %105 = arith.select %103, %101, %104 : vector<2x96xi1>, vector<2x96xf32>
    %106 = vector.shape_cast %105 : vector<2x96xf32> to vector<1x2x96xf32>
    %cst_29 = arith.constant dense<0.000000e+00> : vector<1xf32>
    %107 = vector.multi_reduction <add>, %106, %cst_29 [1, 2] : vector<1x2x96xf32> to vector<1xf32>
    %108 = vector.shape_cast %107 : vector<1xf32> to vector<1x1x1xf32>
    %109 = vector.extract %108[0, 0, 0] : f32 from vector<1x1x1xf32>
    %110 = arith.mulf %86, %94 : vector<2x1xf32>
    %111 = arith.mulf %88, %100 : vector<2x1xf32>
    %112 = arith.addf %110, %111 : vector<2x1xf32>
    %113 = vector.shape_cast %112 : vector<2x1xf32> to vector<1x2x1xf32>
    %cst_30 = arith.constant dense<0.000000e+00> : vector<1xf32>
    %114 = vector.multi_reduction <add>, %113, %cst_30 [1, 2] : vector<1x2x1xf32> to vector<1xf32>
    %115 = vector.shape_cast %114 : vector<1xf32> to vector<1x1x1xf32>
    %116 = vector.extract %115[0, 0, 0] : f32 from vector<1x1x1xf32>
    %117 = arith.subf %116, %109 : f32
    %cst_31 = arith.constant 7.812500e-03 : f32
    %118 = arith.mulf %38, %cst_31 : f32
    %cst_32 = arith.constant 3.125000e-02 : f32
    %119 = arith.mulf %48, %cst_32 : f32
    %120 = arith.addf %118, %119 : f32
    %cst_33 = arith.constant 5.000000e-01 : f32
    %121 = arith.mulf %117, %cst_33 : f32
    %122 = arith.addf %120, %121 : f32
    %123 = vector.broadcast %122 : f32 to vector<1x128xf32>
    %c0_34 = arith.constant 0 : index
    %c0_35 = arith.constant 0 : index
    %124 = vector.load %arg4[%c0_34, %c0_35] : memref<1x128xf32, #tpu.memory_space<vmem>>, vector<1x128xf32>
    tpu.vector_store %arg4[%c0_34, %c0_35], %123 {strides = array<i32>} : memref<1x128xf32, #tpu.memory_space<vmem>>, vector<1x128xf32>,
    return
  }
  func.func @transform_0(%arg0: i32) -> (i32, i32) {
    %c0_i32 = arith.constant 0 : i32
    %c0_i32_0 = arith.constant 0 : i32
    %c0_i32_1 = arith.constant 0 : i32
    return %c0_i32, %c0_i32_0 : i32, i32
  }
  func.func @transform_1(%arg0: i32) -> (i32, i32) {
    %c0_i32 = arith.constant 0 : i32
    %c0_i32_0 = arith.constant 0 : i32
    return %arg0, %c0_i32 : i32, i32
  }
  func.func @transform_2(%arg0: i32) -> (i32, i32) {
    %c0_i32 = arith.constant 0 : i32
    %c0_i32_0 = arith.constant 0 : i32
    return %arg0, %c0_i32 : i32, i32
  }
  func.func @transform_3(%arg0: i32) -> (i32, i32) {
    %c0_i32 = arith.constant 0 : i32
    %c0_i32_0 = arith.constant 0 : i32
    return %c0_i32, %arg0 : i32, i32
  }
}

</mosaic_0001>

<bundles_post_ra>
// kernel: action_loss.1
= control target key start
LH: loop header
LB: loop body
LE: loop exit
PB: predicated region body
PF: predicated region fallthrough
CT: control target
= control target key end

     0   :  { %v24_v1 = vlaneseq  ;;  %s335_s0 = inlined_call_operand.vmem [shape: s32[1,96], index: 0, kind: input, shape index: {}]   ;;  %s336_s1 = inlined_call_operand.vmem [shape: f32[2,96], index: 1, kind: input, shape index: {}]   ;;  %s337_s2 = inlined_call_operand.vmem [shape: f32[2,96], index: 2, kind: input, shape index: {}]   ;;  %s338_s3 = inlined_call_operand.hbm [shape: f32[1,128], index: 3, kind: output, shape index: {}]  }
   0x1   :  { %v242_v0 = vld [vmem:[%s335_s0] sm:$0x1] }
   0x2   :  { %vm20_vm0 = vcmp.eq.s32.totalorder %v242_v0, 9  ;;  %vm19_vm1 = vcmp.eq.s32.totalorder %v242_v0, 8 }
   0x3   :  { %8 = vsyncpa [#allocation3], 0  ;;  %v25_v2 = vshrl.u32 %v24_v1, 7  ;;  %v217_v3 = vmov 0   ;;  %v257_v7 = vld [vmem:[%s336_s1] sm:$0x3] }
   0x4   :  { %v83_v4 = vsel %vm20_vm0, 1, %v217_v3  ;;  %v73_v5 = vsel %vm19_vm1, 1, %v217_v3  ;;  %vm43_vm2 = vcmask 779264   ;;  %v17_v16 = vld [vmem:[%s337_s2] sm:$0x3]  ;;  %vm18_vm5 = vcmp.lt.s32.totalorder %v242_v0, 8  ;;  %vm21_vm9 = vmor %vm19_vm1, %vm20_vm0 }
   0x5   :  { %v252_v6 = vsub.s32 0, %v25_v2  ;;  %v23_v26 = vsel %vm18_vm5, 1, %v217_v3  ;;  %v38_v43 = vsub.f32 1.0, %v17_v16  ;;  %vm22_vm7 = vcmp.ge.s32.totalorder %v242_v0, 10  ;;  %s218_s24 = smov [#allocation2]  }
   0x6   :  { %v54_v47 = vsub.f32 %v257_v7, %v17_v16  ;;  %v56_v48 = vsel %vm22_vm7, 1, %v217_v3  ;;  %v122_v54 = vsel %vm21_vm9, 1, %v217_v3  ;;  %v121_v59 = vmul.f32 %v17_v16, %v257_v7  ;;  %s167_s25 = sshll.u32 %s218_s24, 4  ;;  %s168_s25 = int_to_ptr.vmem [resolvable:$true] %s167_s25 }
   0x7   :  { %v87_v8 = vrot.slane %v83_v4, %v252_v6  ;;  %v77_v9 = vrot.slane %v73_v5, %v252_v6  ;;  %v27_v27 = vrot.slane %v23_v26, %v252_v6  ;;  %v60_v49 = vrot.slane %v56_v48, %v252_v6  ;;  %s195_s27 = scalar_lea.vmem %s168_s25, 16  ;;  %s199_s28 = scalar_lea.vmem %s168_s25, 32 }
   0x8   :  { %v55_v51 = vmul.f32 %v54_v47, %v54_v47  ;;  %v126_v57 = vrot.slane %v122_v54, %v252_v6  ;;  %vm142_vm11 = vcmask 1024   ;;  %p196_p0 = scmp.ne.s32.totalorder %s168_s25, %s195_s27  ;;  %p200_p1 = scmp.lt.s32.totalorder %s168_s25, %s168_s25 }
   0x9   :  { %vm261_vm3 = vcmp.eq.s32.totalorder %v87_v8, 1  ;;  %vm265_vm4 = vcmp.eq.s32.totalorder %v77_v9, 1  ;;  %vm298_vm6 = vcmp.eq.s32.totalorder %v27_v27, 1  ;;  %vm61_vm8 = vcmp.eq.s32.totalorder %v60_v49, 1  ;;  %p201_p2 = scmp.lt.s32.totalorder %s199_s28, %s195_s27 }
   0xa   :  { %v89_v12 = vsel %vm261_vm3, %v257_v7, -inf  ;;  %v79_v13 = vsel %vm265_vm4, %v257_v7, -inf  ;;  %v113_v17 = vsel %vm265_vm4, %v17_v16, 0.0  ;;  %v29_v31 = vsel %vm298_vm6, %v257_v7, 0.5 }
   0xb   :  { %v90_v14 = vsel %vm43_vm2, %v89_v12, -inf  ;;  %v80_v15 = vsel %vm43_vm2, %v79_v13, -inf  ;;  %v114_v18 = vsel %vm43_vm2, %v113_v17, 0.0  ;;  %v33_v33 = vsub.f32 1.0, %v29_v31  ;;  %p202_p3 = por %p201_p2, %p200_p1 }
   0xc   :  { %91 = vmax.xlane.f32.xlu0 %v90_v14  ;;  %v117_v35 = vsel %vm261_vm3, %v17_v16, 0.0  ;;  %v62_v53 = vsel %vm61_vm8, %v55_v51, 0.0  ;;  %vm127_vm10 = vcmp.eq.s32.totalorder %v126_v57, 1 }
   0xd   :  { %v118_v37 = vsel %vm43_vm2, %v117_v35, 0.0  ;;  %v63_v55 = vsel %vm43_vm2, %v62_v53, 0.0  ;;  %v128_v60 = vsel %vm127_vm10, %v121_v59, 0.0  ;;  %p203_p4 = pnand %p202_p3, %p196_p0 }
   0xe   :  { %v129_v61 = vsel %vm43_vm2, %v128_v60, 0.0 }
  0x10   :  { %81 = vmax.xlane.f32.xlu0 %v80_v15 }
  0x14   :  { %115 = vadd.xlane.f32.xlu0 %v114_v18 }
  0x95   :  { %v283_v19 = vpop.xlane.xlu0 %91 }
  0x96   :  { %v94_v20 = vsub.f32 %v257_v7, %v283_v19 }
  0x98   :  { %v95_v23 = vsel %vm261_vm3, %v94_v20, -inf }
  0x99   :  { %v287_v21 = vpop.xlane.xlu0 %81 }
  0x9a   :  { %v93_v22 = vsub.f32 %v257_v7, %v287_v21 }
  0x9c   :  { %v96_v24 = vsel %vm265_vm4, %v93_v22, %v95_v23 }
  0x9d   :  { %v97_v25 = vmul.f32 1.442695, %v96_v24  ;;  %v116_v5 = vpop.xlane.xlu0 %115 }
  0x9f   :  { %185 = vpow2.f32 %v97_v25 }
  0xa0   :  { %187 = vlog2.f32 %v29_v31 }
  0xa1   :  { %189 = vlog2.f32 %v33_v33 }
  0xac   :  { %v186_v28 = vpop.eup %185 }
  0xad   :  { %v99_v30 = vsel %vm265_vm4, %v186_v28, 0.0  ;;  %v103_v34 = vsel %vm261_vm3, %v186_v28, 0.0  ;;  %v188_v38 = vpop.eup %187 }
  0xae   :  { %v100_v32 = vsel %vm43_vm2, %v99_v30, 0.0  ;;  %v104_v36 = vsel %vm43_vm2, %v103_v34, 0.0  ;;  %v190_v39 = vpop.eup %189  ;;  %v31_v40 = vmul.f32 0.6931472, %v188_v38 }
  0xaf   :  { %101 = vadd.xlane.f32.xlu1 %v100_v32  ;;  %v35_v41 = vmul.f32 0.6931472, %v190_v39 }
  0xb0   :  { %v32_v42 = vmax.f32 %v31_v40, -100.0 }
  0xb1   :  { %v36_v44 = vmax.f32 %v35_v41, -100.0 }
  0xb2   :  { %v37_v45 = vmul.f32 %v32_v42, %v17_v16 }
  0xb3   :  { %105 = vadd.xlane.f32.xlu1 %v104_v36  ;;  %v39_v46 = vmul.f32 %v38_v43, %v36_v44 }
  0xb5   :  { %v40_v50 = vadd.f32 %v39_v46, %v37_v45 }
  0xb7   :  { %119 = vadd.xlane.f32.xlu1 %v118_v37  ;;  %v41_v52 = vsub.f32 0.0, %v40_v50 }
  0xb9   :  { %v42_v56 = vsel %vm298_vm6, %v41_v52, 0.0 }
  0xba   :  { %v44_v58 = vsel %vm43_vm2, %v42_v56, 0.0 }
  0xbb   :  { %64 = vadd.xlane.f32.xlu1 %v63_v55  ;;  %45 = vadd.xlane.f32.xlu0 %v44_v58 }
  0xbf   :  { %130 = vadd.xlane.f32.xlu0 %v129_v61 }
 0x138   :  { %v102_v62 = vpop.xlane.xlu1 %101 }
 0x139   :  { %191 = vlog2.f32 %v102_v62 }
 0x13c   :  { %v106_v63 = vpop.xlane.xlu1 %105 }
 0x13d   :  { %193 = vlog2.f32 %v106_v63 }
 0x140   :  { %v120_v6 = vpop.xlane.xlu1 %119 }
 0x144   :  { %v65_v12 = vpop.xlane.xlu1 %64  ;;  %v46_v14 = vpop.xlane.xlu0 %45 }
 0x145   :  { %v66_v13 = vrot.slane %v65_v12, 4  ;;  %v47_v15 = vrot.slane %v46_v14, 4 }
 0x146   :  { %v192_v0 = vpop.eup %191 }
 0x147   :  { %v108_v1 = vmul.f32 0.6931472, %v192_v0  ;;  %v67_v16 = vadd.f32 %v66_v13, %v65_v12  ;;  %v48_v17 = vadd.f32 %v47_v15, %v46_v14 }
 0x148   :  { %v131_v20 = vpop.xlane.xlu0 %130 }
 0x149   :  { %v109_v4 = vadd.f32 %v108_v1, %v287_v21  ;;  %v68_v18 = vrot.slane %v67_v16, 2  ;;  %v49_v22 = vrot.slane %v48_v17, 2  ;;  %v132_v21 = vrot.slane %v131_v20, 4 }
 0x14a   :  { %v194_v2 = vpop.eup %193 }
 0x14b   :  { %v111_v3 = vmul.f32 0.6931472, %v194_v2  ;;  %v139_v8 = vmul.f32 %v116_v5, %v109_v4  ;;  %v69_v23 = vadd.f32 %v68_v18, %v67_v16  ;;  %v133_v24 = vadd.f32 %v132_v21, %v131_v20 }
 0x14c   :  { %v50_v25 = vadd.f32 %v49_v22, %v48_v17 }
 0x14d   :  { %v112_v7 = vadd.f32 %v111_v3, %v283_v19  ;;  %v70_v19 = vrot.slane %v69_v23, 1  ;;  %v134_v26 = vrot.slane %v133_v24, 2 }
 0x14e   :  { %v51_v27 = vrot.slane %v50_v25, 1 }
 0x14f   :  { %v140_v9 = vmul.f32 %v120_v6, %v112_v7  ;;  %v71_v28 = vadd.f32 %v70_v19, %v69_v23  ;;  %v135_v29 = vadd.f32 %v134_v26, %v133_v24 }
 0x150   :  { %v52_v30 = vadd.f32 %v51_v27, %v50_v25 }
 0x151   :  { %v141_v10 = vadd.f32 %v140_v9, %v139_v8  ;;  %v136_v31 = vrot.slane %v135_v29, 1 }
 0x152   :  { %175 = vpush %v52_v30 }
 0x153   :  { %v143_v11 = vsel %vm142_vm11, %v141_v10, 0.0  ;;  %177 = vpush %v71_v28  ;;  %v137_v32 = vadd.f32 %v136_v31, %v135_v29 }
 0x154   :  { %144 = vadd.xlane.f32.xlu1 %v143_v11 }
 0x155   :  { %179 = vpush %v137_v32 }
 0x183   :  { %s176_s2 = spop %175 }
 0x184   :  { %s178_s16 = spop %177  ;;  %s154_s17 = smul.f32 0.0078125, %s176_s2 }
 0x185   :  { %s155_s18 = smul.f32 0.03125, %s178_s16 }
 0x186   :  { %s180_s19 = spop %179 }
 0x187   :  { %s156_s22 = sadd.f32 %s155_s18, %s154_s17 }
 0x1dd   :  { %v145_v33 = vpop.xlane.xlu1 %144 }
 0x1de   :  { %v146_v34 = vrot.slane %v145_v33, 4 }
 0x1e0   :  { %v147_v35 = vadd.f32 %v146_v34, %v145_v33 }
 0x1e2   :  { %v148_v36 = vrot.slane %v147_v35, 2 }
 0x1e4   :  { %v149_v37 = vadd.f32 %v148_v36, %v147_v35 }
 0x1e6   :  { %v150_v38 = vrot.slane %v149_v37, 1 }
 0x1e8   :  { %v151_v39 = vadd.f32 %v150_v38, %v149_v37 }
 0x1ea   :  { %181 = vpush %v151_v39 }
 0x21b   :  { %s182_s20 = spop %181 }
 0x21c   :  { %s153_s21 = ssub.f32 %s182_s20, %s180_s19 }
 0x21e   :  { %s157_s23 = smul.f32 0.5, %s153_s21 }
 0x220   :  { %s158_s26 = sadd.f32 %s157_s23, %s156_s22 }
 0x222   :  { %v159_v40 = vstv %s158_s26 }
 0x223   :  { %160 = vst [vmem:[#allocation2] sm:$0x1] %v159_v40 }
 0x224   :  { %206 = shalt.err (!%p203_p4)
}
 0x225   :  { %170 = dma.vmem_to_hbm [thread:$0]  %s168_s25, 16, %s338_s3, [#allocation3]  }
 0x226   :  { %215 = dma.done.wait [#allocation3], 16  }
 0x227   :  { %216 = vsyncadd [#allocation3], 4294967280 }
 0x228   :  { %174 = vsyncpa [#allocation3], 1 }

</bundles_post_ra>
